<compile_context>
chip_gen: v7x
topology: tpu7x:2x2x1
jax: 0.10.0
libtpu: 0.0.40
codegen_flags: <defaults>
</compile_context>

<pallas_src>
import functools

import jax
import jax.numpy as jnp
from jax.experimental import pallas as pl
from jax.experimental.pallas import tpu as pltpu

_EPS = 1e-12  # torch.nn.functional.normalize default eps


def _partial_cos_kernel(pred_ref, target_ref, out_ref, *, tile_n, n_rows,
                        mask_tail):
    """Per-block partial sum of row-wise cosine similarities."""
    p = pred_ref[...].astype(jnp.float32)     # (tile_n, Cpad)
    t = target_ref[...].astype(jnp.float32)   # (tile_n, Cpad)

    # Three lane-axis reductions instead of two full-tile normalizes.
    pp = jnp.sum(p * p, axis=1, keepdims=True)   # (tile_n, 1)
    tt = jnp.sum(t * t, axis=1, keepdims=True)   # (tile_n, 1)
    pt = jnp.sum(p * t, axis=1, keepdims=True)   # (tile_n, 1)

    # F.normalize semantics x / max(||x||, eps), expressed with rsqrt on the
    # EUP: 1 / max(sqrt(x), eps) == min(rsqrt(x), 1/eps).
    inv_eps = 1.0 / _EPS
    cos = (pt
           * jnp.minimum(jax.lax.rsqrt(pp), inv_eps)
           * jnp.minimum(jax.lax.rsqrt(tt), inv_eps))   # (tile_n, 1)

    if mask_tail:
        # Only emitted when N % tile_n != 0: mask the garbage rows of the
        # final (padded) edge block. NaN-safe because jnp.where selects.
        i = pl.program_id(0)
        row = jax.lax.broadcasted_iota(jnp.int32, (tile_n, 1), 0) + i * tile_n
        cos = jnp.where(row < n_rows, cos, 0.0)

    s = jnp.sum(cos)                              # scalar partial sum
    out_ref[...] = jnp.broadcast_to(s, out_ref.shape).astype(jnp.float32)


def _pick_tile_n(n, row_bytes, row_mult):
    """Pick the row-tile size for the 1-D grid over N."""
    if n < 2 * row_mult:
        return n  # single block; block dim == full array dim is always legal.

    # ~4 MiB per input block: 2 inputs x 2 pipeline buffers ~= 16 MiB of VMEM
    # buffers, fitting the 48 MiB scoped limit with headroom on v7x (64 MiB
    # physical) and trivially on v5e / v6e (128 MiB physical).
    budget = 4 * 1024 * 1024
    tile = (budget // max(1, row_bytes)) // row_mult * row_mult
    tile = max(row_mult, tile)

    # Guarantee >= 2 grid blocks so the "parallel" axis can shard across both
    # TensorCores on v7x (harmless on single-TC v5e / v6e).
    tile = min(tile, (n - 1) // row_mult * row_mult)

    # Prefer a tile that divides N exactly (statically removes the tail mask),
    # but never shrink the tile by more than 2x to find one.
    for cand in range(tile, max(row_mult, tile // 2), -row_mult):
        if n % cand == 0:
            return cand
    return tile


def negative_cosine_similarity_loss(pred, target, neg=None, loss_weight=1.0,
                                    tile_n=None):
    """Pallas TPU implementation of NegativeCosineSimilarityLoss.forward."""
    del neg  # unused in the reference forward pass
    assert pred.shape == target.shape and pred.ndim == 2
    n, c = pred.shape

    target = jax.lax.stop_gradient(target)  # mirrors target.detach()

    # Lane-dense channel dim: zero-pad C up to a multiple of 128. Zeros leave
    # pp / tt / pt (and therefore the cosine) unchanged.
    c_pad = (-c) % 128
    if c_pad:
        pred = jnp.pad(pred, ((0, 0), (0, c_pad)))
        target = jnp.pad(target, ((0, 0), (0, c_pad)))
    cpad = c + c_pad

    itemsize = jnp.dtype(pred.dtype).itemsize
    row_mult = 8 * max(1, 4 // itemsize)   # 8 f32 / 16 bf16 / 32 int8-fp8

    if tile_n is None:
        tile_n = _pick_tile_n(n, cpad * itemsize, row_mult)
    assert tile_n == n or (tile_n % row_mult == 0 and tile_n <= n), (
        "tile_n must be a multiple of the dtype packing factor (or equal N)")

    num_blocks = pl.cdiv(n, tile_n)
    mask_tail = (n % tile_n) != 0
    kernel = functools.partial(_partial_cos_kernel, tile_n=tile_n, n_rows=n,
                               mask_tail=mask_tail)

    partials = pl.pallas_call(
        kernel,
        out_shape=jax.ShapeDtypeStruct((num_blocks, 8, 128), jnp.float32),
        grid=(num_blocks,),
        in_specs=[
            pl.BlockSpec((tile_n, cpad), lambda i: (i, 0)),
            pl.BlockSpec((tile_n, cpad), lambda i: (i, 0)),
        ],
        out_specs=pl.BlockSpec((1, 8, 128), lambda i: (i, 0, 0)),
        compiler_params=pltpu.CompilerParams(
            dimension_semantics=("parallel",),
            # ~16 MiB of double-buffered input tiles + f32 intermediates fits
            # easily; 48 MiB is safe on all of v5e / v6e / v7x.
            vmem_limit_bytes=48 * 1024 * 1024,
        ),
    )(pred, target)

    total = jnp.sum(partials[:, 0, 0])   # one scalar per block
    return -(total / n) * loss_weight


if __name__ == "__main__":
    key = jax.random.PRNGKey(0)
    k1, k2, k3, k4, k5 = jax.random.split(key, 5)

    def ref(p, t, w=1.0, eps=_EPS):
        p = p.astype(jnp.float32)
        t = t.astype(jnp.float32)
        pn = p / jnp.maximum(jnp.linalg.norm(p, axis=1, keepdims=True), eps)
        tn = t / jnp.maximum(jnp.linalg.norm(t, axis=1, keepdims=True), eps)
        return -jnp.mean(jnp.sum(pn * tn, axis=1)) * w

    # Case 1: single-block path (small N, narrow C padded to 128 lanes).
    N, C = 8, 32
    pred = jax.random.normal(k1, (N, C), dtype=jnp.float32)
    target = jax.random.normal(k2, (N, C), dtype=jnp.float32)
    neg = jax.random.normal(k3, (N, C), dtype=jnp.float32)  # unused by the loss
    loss = jax.block_until_ready(
        negative_cosine_similarity_loss(pred, target, neg, loss_weight=1.0))
    assert jnp.allclose(loss, ref(pred, target), atol=1e-5, rtol=1e-5), (
        loss, ref(pred, target))

    # Case 2: tiled path with a masked tail block (N not a multiple of tile_n).
    N2, C2, TILE = 20, 32, 8
    pred2 = jax.random.normal(k4, (N2, C2), dtype=jnp.float32)
    target2 = jax.random.normal(k5, (N2, C2), dtype=jnp.float32)
    loss2 = jax.block_until_ready(
        negative_cosine_similarity_loss(pred2, target2, None,
                                        loss_weight=0.5, tile_n=TILE))
    assert jnp.allclose(loss2, ref(pred2, target2, w=0.5),
                        atol=1e-5, rtol=1e-5), (loss2, ref(pred2, target2, 0.5))

    # Case 3: bf16 inputs (native-dtype DMA, f32 in-kernel accumulation) with
    # an auto-picked tile that forces >= 2 grid blocks.
    N3, C3 = 64, 48
    pred3 = jax.random.normal(k1, (N3, C3), dtype=jnp.bfloat16)
    target3 = jax.random.normal(k2, (N3, C3), dtype=jnp.bfloat16)
    loss3 = jax.block_until_ready(
        negative_cosine_similarity_loss(pred3, target3, None, loss_weight=2.0))
    assert jnp.allclose(loss3, ref(pred3, target3, w=2.0),
                        atol=2e-2, rtol=2e-2), (loss3, ref(pred3, target3, 2.0))

    print("KERNEL_OK")
</pallas_src>

<mosaic_0001>
module attributes {stable_mosaic.version = 11 : i64} {
  func.func @_partial_cos_kernel(%arg0: i32, %arg1: memref<8x128xf32, #tpu.memory_space<vmem>>, %arg2: memref<8x128xf32, #tpu.memory_space<vmem>>, %arg3: memref<1x8x128xf32, #tpu.memory_space<vmem>>) attributes {dimension_semantics = [#tpu.dimension_semantics<parallel>], iteration_bounds = array<i64: 1>, scalar_prefetch = 0 : i64, scratch_operands = 0 : i64, tpu.core_type = #tpu.core_type<tc>, window_params = [{transform_indices = @transform_0, window_bounds = array<i64: 8, 128>}, {transform_indices = @transform_1, window_bounds = array<i64: 8, 128>}, {transform_indices = @transform_2, window_bounds = array<i64: 1, 8, 128>}]} {
    %c0 = arith.constant 0 : index
    %c0_0 = arith.constant 0 : index
    %0 = vector.load %arg1[%c0, %c0_0] : memref<8x128xf32, #tpu.memory_space<vmem>>, vector<8x128xf32>
    %c0_1 = arith.constant 0 : index
    %c0_2 = arith.constant 0 : index
    %1 = vector.load %arg2[%c0_1, %c0_2] : memref<8x128xf32, #tpu.memory_space<vmem>>, vector<8x128xf32>
    %2 = arith.mulf %0, %0 : vector<8x128xf32>
    %cst = arith.constant dense<0.000000e+00> : vector<8xf32>
    %3 = vector.multi_reduction <add>, %2, %cst [1] : vector<8x128xf32> to vector<8xf32>
    %4 = vector.shape_cast %3 : vector<8xf32> to vector<8x1xf32>
    %5 = arith.mulf %1, %1 : vector<8x128xf32>
    %cst_3 = arith.constant dense<0.000000e+00> : vector<8xf32>
    %6 = vector.multi_reduction <add>, %5, %cst_3 [1] : vector<8x128xf32> to vector<8xf32>
    %7 = vector.shape_cast %6 : vector<8xf32> to vector<8x1xf32>
    %8 = arith.mulf %0, %1 : vector<8x128xf32>
    %cst_4 = arith.constant dense<0.000000e+00> : vector<8xf32>
    %9 = vector.multi_reduction <add>, %8, %cst_4 [1] : vector<8x128xf32> to vector<8xf32>
    %10 = vector.shape_cast %9 : vector<8xf32> to vector<8x1xf32>
    %11 = math.rsqrt %4 : vector<8x1xf32>
    %cst_5 = arith.constant 9.99999995E+11 : f32
    %12 = vector.broadcast %cst_5 : f32 to vector<8x1xf32>
    %13 = arith.minimumf %11, %12 : vector<8x1xf32>
    %14 = arith.mulf %10, %13 : vector<8x1xf32>
    %15 = math.rsqrt %7 : vector<8x1xf32>
    %cst_6 = arith.constant 9.99999995E+11 : f32
    %16 = vector.broadcast %cst_6 : f32 to vector<8x1xf32>
    %17 = arith.minimumf %15, %16 : vector<8x1xf32>
    %18 = arith.mulf %14, %17 : vector<8x1xf32>
    %19 = vector.shape_cast %18 : vector<8x1xf32> to vector<1x8x1xf32>
    %cst_7 = arith.constant dense<0.000000e+00> : vector<1xf32>
    %20 = vector.multi_reduction <add>, %19, %cst_7 [1, 2] : vector<1x8x1xf32> to vector<1xf32>
    %21 = vector.shape_cast %20 : vector<1xf32> to vector<1x1x1xf32>
    %22 = vector.extract %21[0, 0, 0] : f32 from vector<1x1x1xf32>
    %23 = vector.broadcast %22 : f32 to vector<1x8x128xf32>
    %c0_8 = arith.constant 0 : index
    %c0_9 = arith.constant 0 : index
    %c0_10 = arith.constant 0 : index
    %24 = vector.load %arg3[%c0_8, %c0_9, %c0_10] : memref<1x8x128xf32, #tpu.memory_space<vmem>>, vector<1x8x128xf32>
    tpu.vector_store %arg3[%c0_8, %c0_9, %c0_10], %23 {strides = array<i32>} : memref<1x8x128xf32, #tpu.memory_space<vmem>>, vector<1x8x128xf32>,
    return
  }
  func.func @transform_0(%arg0: i32) -> (i32, i32) {
    %c0_i32 = arith.constant 0 : i32
    %c0_i32_0 = arith.constant 0 : i32
    return %arg0, %c0_i32 : i32, i32
  }
  func.func @transform_1(%arg0: i32) -> (i32, i32) {
    %c0_i32 = arith.constant 0 : i32
    %c0_i32_0 = arith.constant 0 : i32
    return %arg0, %c0_i32 : i32, i32
  }
  func.func @transform_2(%arg0: i32) -> (i32, i32, i32) {
    %c0_i32 = arith.constant 0 : i32
    %c0_i32_0 = arith.constant 0 : i32
    %c0_i32_1 = arith.constant 0 : i32
    return %arg0, %c0_i32, %c0_i32_0 : i32, i32, i32
  }
}

</mosaic_0001>

<bundles_post_ra>
// kernel: tpu_custom_call.1
= control target key start
LH: loop header
LB: loop body
LE: loop exit
PB: predicated region body
PF: predicated region fallthrough
CT: control target
= control target key end

     0   :  { %7 = vsyncpa [#allocation3], 0  ;;  %s217_s0 = inlined_call_operand.hbm [shape: f32[8,128], index: 0, kind: input, shape index: {}]   ;;  %s218_s1 = inlined_call_operand.hbm [shape: f32[8,128], index: 1, kind: input, shape index: {}]   ;;  %s219_s2 = inlined_call_operand.hbm [shape: f32[1,8,128], index: 2, kind: output, shape index: {}]  }
   0x1   :  { %8 = vsyncpa [#allocation6], 0 }
   0x2   :  { %9 = vsyncpa [#allocation4], 0  ;;  %s163_s9 = smov [#allocation2]   ;;  %s164_s11 = smov [#allocation5]  }
   0x3   :  { %s16_s10 = sshll.u32 %s163_s9, 4  ;;  %s26_s12 = sshll.u32 %s164_s11, 4  ;;  %s17_s10 = int_to_ptr.vmem [resolvable:$true] %s16_s10  ;;  %s27_s12 = int_to_ptr.vmem [resolvable:$true] %s26_s12 }
   0x4   :  { %s91_s15 = scalar_lea.hbm %s217_s0, 128 }
   0x5   :  { %p92_p0 = scmp.ne.s32.totalorder %s217_s0, %s91_s15  ;;  %p95_p1 = scmp.lt.u32.totalorder %s91_s15, %s217_s0 }
   0x7   :  { %p97_p2 = pnand %p95_p1, %p92_p0 }
   0x9   :  { %100 = shalt.err (!%p97_p2)
}
   0xa   :  { %s101_s20 = scalar_lea.vmem %s17_s10, 128  ;;  %p106_p4 = scmp.lt.s32.totalorder %s17_s10, %s17_s10 }
   0xb   :  { %p102_p3 = scmp.ne.s32.totalorder %s17_s10, %s101_s20  ;;  %p107_p5 = scmp.lt.s32.totalorder %s101_s20, %s101_s20 }
   0xd   :  { %p108_p6 = por %p107_p5, %p106_p4 }
   0xf   :  { %p109_p7 = pnand %p108_p6, %p102_p3 }
  0x11   :  { %112 = shalt.err (!%p109_p7)
}
  0x12   :  { %19 = dma.hbm_to_vmem [thread:$0]  %s217_s0, 128, %s17_s10, [#allocation3]  }
  0x13   :  { %s113_s25 = scalar_lea.hbm %s218_s1, 128 }
  0x14   :  { %p114_p8 = scmp.ne.s32.totalorder %s218_s1, %s113_s25  ;;  %p117_p9 = scmp.lt.u32.totalorder %s113_s25, %s218_s1 }
  0x16   :  { %p119_p10 = pnand %p117_p9, %p114_p8 }
  0x18   :  { %122 = shalt.err (!%p119_p10)
}
  0x19   :  { %s123_s30 = scalar_lea.vmem %s27_s12, 128  ;;  %p128_p12 = scmp.lt.s32.totalorder %s27_s12, %s27_s12 }
  0x1a   :  { %p124_p11 = scmp.ne.s32.totalorder %s27_s12, %s123_s30  ;;  %p129_p13 = scmp.lt.s32.totalorder %s123_s30, %s123_s30 }
  0x1c   :  { %p130_p0 = por %p129_p13, %p128_p12 }
  0x1e   :  { %p131_p1 = pnand %p130_p0, %p124_p11 }
  0x20   :  { %134 = shalt.err (!%p131_p1)
}
  0x21   :  { %29 = dma.hbm_to_vmem [thread:$0]  %s218_s1, 128, %s27_s12, [#allocation6]  }
  0x22   :  { %157 = dma.done.wait [#allocation3], 128  }
  0x23   :  { %158 = vsyncadd [#allocation3], 4294967168 }
  0x24   :  { %159 = dma.done.wait [#allocation6], 128  }
  0x25   :  { %160 = vsyncadd [#allocation6], 4294967168  ;;  %v36_v0 = vld [vmem:[#allocation2] sm:$0xff]  ;;  %v37_v1 = vld [vmem:[#allocation5] sm:$0xff]  ;;  %vm53_vm0 = vcmask 7168   ;;  %s165_s1 = smov [#allocation7]  }
  0x26   :  { %v38_v2 = vmul.f32 %v36_v0, %v36_v0  ;;  %v44_v3 = vmul.f32 %v37_v1, %v36_v0  ;;  %v41_v4 = vmul.f32 %v37_v1, %v37_v1  ;;  %s72_s4 = sshll.u32 %s165_s1, 4  ;;  %s73_s4 = int_to_ptr.vmem [resolvable:$true] %s72_s4 }
  0x27   :  { %s135_s6 = scalar_lea.vmem %s73_s4, 128  ;;  %p140_p3 = scmp.lt.s32.totalorder %s73_s4, %s73_s4 }
  0x28   :  { %39 = vadd.xlane.f32.xlu0 %v38_v2  ;;  %45 = vadd.xlane.f32.xlu1 %v44_v3  ;;  %p136_p2 = scmp.ne.s32.totalorder %s73_s4, %s135_s6  ;;  %p141_p4 = scmp.lt.s32.totalorder %s135_s6, %s135_s6 }
  0x2a   :  { %p142_p5 = por %p141_p4, %p140_p3 }
  0x2c   :  { %42 = vadd.xlane.f32.xlu0 %v41_v4  ;;  %p143_p6 = pnand %p142_p5, %p136_p2 }
  0xb5   :  { %v40_v5 = vpop.xlane.xlu0 %39  ;;  %v46_v9 = vpop.xlane.xlu1 %45 }
  0xb6   :  { %87 = vrsqrt.f32 %v40_v5 }
  0xb9   :  { %v43_v6 = vpop.xlane.xlu0 %42 }
  0xba   :  { %89 = vrsqrt.f32 %v43_v6 }
  0xc0   :  { %v88_v7 = vpop.eup %87 }
  0xc1   :  { %v48_v8 = vmin.f32 %v88_v7, 1e+12 }
  0xc3   :  { %v49_v12 = vmul.f32 %v48_v8, %v46_v9 }
  0xc4   :  { %v90_v10 = vpop.eup %89 }
  0xc5   :  { %v51_v11 = vmin.f32 %v90_v10, 1e+12 }
  0xc7   :  { %v52_v13 = vmul.f32 %v51_v11, %v49_v12 }
  0xc9   :  { %v54_v14 = vsel %vm53_vm0, %v52_v13, 0.0 }
  0xca   :  { %55 = vadd.xlane.f32.xlu1 %v54_v14 }
 0x157   :  { %v56_v15 = vpop.xlane.xlu1 %55 }
 0x158   :  { %v57_v16 = vrot.slane %v56_v15, 4 }
 0x15a   :  { %v58_v17 = vadd.f32 %v57_v16, %v56_v15 }
 0x15c   :  { %v59_v18 = vrot.slane %v58_v17, 2 }
 0x15e   :  { %v60_v19 = vadd.f32 %v59_v18, %v58_v17 }
 0x160   :  { %v61_v20 = vrot.slane %v60_v19, 1 }
 0x162   :  { %v62_v21 = vadd.f32 %v61_v20, %v60_v19 }
 0x164   :  { %82 = vpush %v62_v21 }
 0x195   :  { %s83_s5 = spop %82 }
 0x196   :  { %v64_v22 = vstv %s83_s5 }
 0x197   :  { %65 = vst [vmem:[#allocation7] sm:$0xff] %v64_v22 }
 0x198   :  { %146 = shalt.err (!%p143_p6)
}
 0x199   :  { %s147_s9 = scalar_lea.hbm %s219_s2, 128 }
 0x19a   :  { %p148_p7 = scmp.ne.s32.totalorder %s219_s2, %s147_s9  ;;  %p151_p8 = scmp.lt.u32.totalorder %s147_s9, %s219_s2 }
 0x19c   :  { %p153_p9 = pnand %p151_p8, %p148_p7 }
 0x19e   :  { %156 = shalt.err (!%p153_p9)
}
 0x19f   :  { %75 = dma.vmem_to_hbm [thread:$0]  %s73_s4, 128, %s219_s2, [#allocation4]  }
 0x1a0   :  { %161 = dma.done.wait [#allocation4], 128  }
 0x1a1   :  { %162 = vsyncadd [#allocation4], 4294967168 }
 0x1a2   :  { %79 = vsyncpa [#allocation3], 1 }
 0x1a3   :  { %80 = vsyncpa [#allocation6], 1 }
 0x1a4   :  { %81 = vsyncpa [#allocation4], 1 }

</bundles_post_ra>
